<compile_context>
chip_gen: v7x
topology: tpu7x:2x2x1
jax: 0.10.0
libtpu: 0.0.40
codegen_flags: <defaults>
</compile_context>

<pallas_src>
import functools

import jax
import jax.numpy as jnp
from jax import lax
from jax.experimental import pallas as pl
from jax.experimental.pallas import tpu as pltpu


# ----------------------------------------------------------------------------
# Fused MHA kernel: one grid step == one batch element, heads unrolled.
# ----------------------------------------------------------------------------
def _fused_mha_kernel(q_in_ref, k_in_ref, v_in_ref, wq_ref, wk_ref, wv_ref,
                      wo_ref, o_ref, *, num_heads, d_k, d_v, causal):
    x_q = q_in_ref[0]  # (Lq, d_model)
    x_k = k_in_ref[0]  # (Lk, d_model)
    x_v = v_in_ref[0]  # (Lk, d_model)

    # Fused projections — one wide MXU pass per input (N = H*d_k / H*d_v).
    # W_q already carries the 1/sqrt(d_k) softmax scale (folded at setup).
    q = jnp.dot(x_q, wq_ref[...], preferred_element_type=jnp.float32)  # (Lq, H*d_k)
    k = jnp.dot(x_k, wk_ref[...], preferred_element_type=jnp.float32)  # (Lk, H*d_k)
    v = jnp.dot(x_v, wv_ref[...], preferred_element_type=jnp.float32)  # (Lk, H*d_v)
    wo = wo_ref[...]                                                   # (H*d_v, d_out)

    lq = q.shape[0]
    lk = k.shape[0]

    if causal:
        row = lax.broadcasted_iota(jnp.int32, (lq, lk), 0)
        col = lax.broadcasted_iota(jnp.int32, (lq, lk), 1)
        allow = col <= row

    d_model_out = o_ref.shape[-1]
    acc = jnp.zeros((lq, d_model_out), dtype=jnp.float32)

    # Static (unrolled) loop over heads; everything stays resident in VMEM.
    for h in range(num_heads):
        qh = q[:, h * d_k:(h + 1) * d_k]  # (Lq, d_k)
        kh = k[:, h * d_k:(h + 1) * d_k]  # (Lk, d_k)
        vh = v[:, h * d_v:(h + 1) * d_v]  # (Lk, d_v)

        # Contract last dims of both operands: no explicit K transpose.
        s = lax.dot_general(
            qh, kh,
            dimension_numbers=(((1,), (1,)), ((), ())),
            preferred_element_type=jnp.float32,
        )  # (Lq, Lk)

        if causal:
            s = jnp.where(allow, s, -1e30)  # finite mask value: no NaN risk

        # Numerically stable softmax; divide folded into the small PV result.
        m = jnp.max(s, axis=-1, keepdims=True)
        p = jnp.exp(s - m)
        denom = jnp.sum(p, axis=-1, keepdims=True)
        inv_denom = pl.reciprocal(denom, approx=True)  # EUP slot — off crit path

        oh = jnp.dot(p, vh, preferred_element_type=jnp.float32) * inv_denom  # (Lq, d_v)

        # Fold output projection into the head loop:
        #   concat_h(o_h) @ W_o  ==  sum_h  o_h @ W_o[h*d_v:(h+1)*d_v, :]
        acc = acc + jnp.dot(
            oh, wo[h * d_v:(h + 1) * d_v, :],
            preferred_element_type=jnp.float32,
        )

    o_ref[0] = acc.astype(o_ref.dtype)  # lane-dense (Lq, d_model) store


# ----------------------------------------------------------------------------
# Module-equivalent forward (pad_attn_mask=None path).
# ----------------------------------------------------------------------------
def multi_head_attention_forward(Q, K, V, params, *, num_heads, d_k, d_v, causal):
    """Equivalent to MultiHeadAttention.forward with pad_attn_mask=None.

    Q, K, V: (batch, seq, d_model) float32.
    params: weights stored as (in_features, out_features), with the 1/sqrt(d_k)
            softmax scale ALREADY folded into params["W_q"]
            (see fold_softmax_scale).
    """
    B, Lq, d_model = Q.shape
    Lk = K.shape[1]
    Lv = V.shape[1]
    assert Lk == Lv, "len_k and len_v must be equal"

    Wq, Wk, Wv, Wo = params["W_q"], params["W_k"], params["W_v"], params["W_o"]
    d_model_out = Wo.shape[1]

    kernel = functools.partial(
        _fused_mha_kernel, num_heads=num_heads, d_k=d_k, d_v=d_v, causal=causal
    )

    return pl.pallas_call(
        kernel,
        out_shape=jax.ShapeDtypeStruct((B, Lq, d_model_out), jnp.float32),
        grid=(B,),
        in_specs=[
            pl.BlockSpec((1, Lq, d_model), lambda b: (b, 0, 0)),
            pl.BlockSpec((1, Lk, d_model), lambda b: (b, 0, 0)),
            pl.BlockSpec((1, Lv, d_model), lambda b: (b, 0, 0)),
            pl.BlockSpec((d_model, num_heads * d_k), lambda b: (0, 0)),
            pl.BlockSpec((d_model, num_heads * d_k), lambda b: (0, 0)),
            pl.BlockSpec((d_model, num_heads * d_v), lambda b: (0, 0)),
            pl.BlockSpec((num_heads * d_v, d_model_out), lambda b: (0, 0)),
        ],
        out_specs=pl.BlockSpec((1, Lq, d_model_out), lambda b: (b, 0, 0)),
        compiler_params=pltpu.CompilerParams(
            dimension_semantics=("parallel",)
        ),
    )(Q, K, V, Wq, Wk, Wv, Wo)


def fold_softmax_scale(params, d_k):
    """One-time (host-side) fold of 1/sqrt(d_k) into W_q."""
    scale = 1.0 / float(d_k) ** 0.5
    folded = dict(params)
    folded["W_q"] = params["W_q"] * scale
    return folded


# ----------------------------------------------------------------------------
# Pure-JAX reference (raw, unscaled parameters; true-f32 matmul precision).
# ----------------------------------------------------------------------------
def reference_forward(Q, K, V, params, *, num_heads, d_k, d_v, causal):
    hp = jax.lax.Precision.HIGHEST
    B, Lq, d_model = Q.shape
    Lk = K.shape[1]
    q = jnp.einsum("bld,df->blf", Q, params["W_q"], precision=hp)
    k = jnp.einsum("bld,df->blf", K, params["W_k"], precision=hp)
    v = jnp.einsum("bld,df->blf", V, params["W_v"], precision=hp)
    q = q.reshape(B, Lq, num_heads, d_k).transpose(0, 2, 1, 3)
    k = k.reshape(B, Lk, num_heads, d_k).transpose(0, 2, 1, 3)
    v = v.reshape(B, Lk, num_heads, d_v).transpose(0, 2, 1, 3)
    s = jnp.einsum("bhqd,bhkd->bhqk", q, k, precision=hp) / (d_k ** 0.5)
    if causal:
        mask = jnp.tril(jnp.ones((Lq, Lk), dtype=bool))
        s = jnp.where(mask[None, None], s, -jnp.inf)
    p = jax.nn.softmax(s, axis=-1)
    o = jnp.einsum("bhqk,bhkd->bhqd", p, v, precision=hp)
    o = o.transpose(0, 2, 1, 3).reshape(B, Lq, num_heads * d_v)
    return jnp.einsum("blf,fo->blo", o, params["W_o"], precision=hp)


# ----------------------------------------------------------------------------
# Main
# ----------------------------------------------------------------------------
if __name__ == "__main__":
    batch = 2
    seq = 8
    num_heads = 4
    d_model = 32
    d_k = 8
    d_v = 8
    causal = True

    key = jax.random.PRNGKey(0)
    kq, kk, kv, kwq, kwk, kwv, kwo = jax.random.split(key, 7)

    Q = jax.random.normal(kq, (batch, seq, d_model), dtype=jnp.float32)
    K = jax.random.normal(kk, (batch, seq, d_model), dtype=jnp.float32)
    V = jax.random.normal(kv, (batch, seq, d_model), dtype=jnp.float32)

    # nn.Linear(bias=False)-shaped weights, stored as (in_features, out_features).
    w_scale = 1.0 / (d_model ** 0.5)
    params = {
        "W_q": jax.random.normal(kwq, (d_model, num_heads * d_k), jnp.float32) * w_scale,
        "W_k": jax.random.normal(kwk, (d_model, num_heads * d_k), jnp.float32) * w_scale,
        "W_v": jax.random.normal(kwv, (d_model, num_heads * d_v), jnp.float32) * w_scale,
        "W_o": jax.random.normal(kwo, (num_heads * d_v, d_model), jnp.float32)
        * (1.0 / (num_heads * d_v) ** 0.5),
    }

    # One-time fold of the softmax scale into W_q (not a per-call wrapper op).
    fused_params = fold_softmax_scale(params, d_k)

    out = multi_head_attention_forward(
        Q, K, V, fused_params, num_heads=num_heads, d_k=d_k, d_v=d_v, causal=causal
    )
    out = jax.block_until_ready(out)

    ref = reference_forward(
        Q, K, V, params, num_heads=num_heads, d_k=d_k, d_v=d_v, causal=causal
    )
    assert out.shape == (batch, seq, d_model)

    # Scale-relative check: the reference is true-f32 (Precision.HIGHEST), while
    # the kernel path runs at the backend's DEFAULT matmul precision
    # (bf16-truncated operands under XLA / interpret mode), which contributes
    # O(1e-2) absolute noise here.  Logic bugs (wrong mask / head slice / scale)
    # would produce errors on the order of ref_scale itself, >10x this bound.
    max_err = float(jnp.max(jnp.abs(out - ref)))
    ref_scale = float(jnp.max(jnp.abs(ref)))
    assert max_err <= 0.08 * ref_scale + 1e-4, (
        f"mismatch vs reference: max_abs_err={max_err:.3e}, ref_scale={ref_scale:.3e}"
    )

    print("KERNEL_OK")
</pallas_src>

<mosaic_0001>
module attributes {stable_mosaic.version = 11 : i64} {
  func.func @_fused_mha_kernel(%arg0: i32, %arg1: memref<1x8x32xf32, #tpu.memory_space<vmem>>, %arg2: memref<1x8x32xf32, #tpu.memory_space<vmem>>, %arg3: memref<1x8x32xf32, #tpu.memory_space<vmem>>, %arg4: memref<32x32xf32, #tpu.memory_space<vmem>>, %arg5: memref<32x32xf32, #tpu.memory_space<vmem>>, %arg6: memref<32x32xf32, #tpu.memory_space<vmem>>, %arg7: memref<32x32xf32, #tpu.memory_space<vmem>>, %arg8: memref<1x8x32xf32, #tpu.memory_space<vmem>>) attributes {dimension_semantics = [#tpu.dimension_semantics<parallel>], iteration_bounds = array<i64: 2>, scalar_prefetch = 0 : i64, scratch_operands = 0 : i64, tpu.core_type = #tpu.core_type<tc>, window_params = [{transform_indices = @transform_0, window_bounds = array<i64: 1, 8, 32>}, {transform_indices = @transform_1, window_bounds = array<i64: 1, 8, 32>}, {transform_indices = @transform_2, window_bounds = array<i64: 1, 8, 32>}, {pipeline_mode = #tpu.pipeline_mode<synchronous>, transform_indices = @transform_3, window_bounds = array<i64: 32, 32>}, {pipeline_mode = #tpu.pipeline_mode<synchronous>, transform_indices = @transform_4, window_bounds = array<i64: 32, 32>}, {pipeline_mode = #tpu.pipeline_mode<synchronous>, transform_indices = @transform_5, window_bounds = array<i64: 32, 32>}, {pipeline_mode = #tpu.pipeline_mode<synchronous>, transform_indices = @transform_6, window_bounds = array<i64: 32, 32>}, {transform_indices = @transform_7, window_bounds = array<i64: 1, 8, 32>}]} {
    %c0 = arith.constant 0 : index
    %c0_0 = arith.constant 0 : index
    %c0_1 = arith.constant 0 : index
    %0 = vector.load %arg1[%c0, %c0_0, %c0_1] : memref<1x8x32xf32, #tpu.memory_space<vmem>>, vector<1x8x32xf32>
    %1 = vector.shape_cast %0 : vector<1x8x32xf32> to vector<8x32xf32>
    %c0_2 = arith.constant 0 : index
    %c0_3 = arith.constant 0 : index
    %c0_4 = arith.constant 0 : index
    %2 = vector.load %arg2[%c0_2, %c0_3, %c0_4] : memref<1x8x32xf32, #tpu.memory_space<vmem>>, vector<1x8x32xf32>
    %3 = vector.shape_cast %2 : vector<1x8x32xf32> to vector<8x32xf32>
    %c0_5 = arith.constant 0 : index
    %c0_6 = arith.constant 0 : index
    %c0_7 = arith.constant 0 : index
    %4 = vector.load %arg3[%c0_5, %c0_6, %c0_7] : memref<1x8x32xf32, #tpu.memory_space<vmem>>, vector<1x8x32xf32>
    %5 = vector.shape_cast %4 : vector<1x8x32xf32> to vector<8x32xf32>
    %c0_8 = arith.constant 0 : index
    %c0_9 = arith.constant 0 : index
    %6 = vector.load %arg4[%c0_8, %c0_9] : memref<32x32xf32, #tpu.memory_space<vmem>>, vector<32x32xf32>
    %cst = arith.constant dense<0.000000e+00> : vector<8x32xf32>
    %7 = tpu.matmul %1, %6, %cst {dimension_numbers = #tpu.dot_dimension_numbers<[1], [0], [0], [1], [0, 0, 1, 1], [], []>} : vector<8x32xf32>, vector<32x32xf32>, vector<8x32xf32> -> vector<8x32xf32>
    %c0_10 = arith.constant 0 : index
    %c0_11 = arith.constant 0 : index
    %8 = vector.load %arg5[%c0_10, %c0_11] : memref<32x32xf32, #tpu.memory_space<vmem>>, vector<32x32xf32>
    %cst_12 = arith.constant dense<0.000000e+00> : vector<8x32xf32>
    %9 = tpu.matmul %3, %8, %cst_12 {dimension_numbers = #tpu.dot_dimension_numbers<[1], [0], [0], [1], [0, 0, 1, 1], [], []>} : vector<8x32xf32>, vector<32x32xf32>, vector<8x32xf32> -> vector<8x32xf32>
    %c0_13 = arith.constant 0 : index
    %c0_14 = arith.constant 0 : index
    %10 = vector.load %arg6[%c0_13, %c0_14] : memref<32x32xf32, #tpu.memory_space<vmem>>, vector<32x32xf32>
    %cst_15 = arith.constant dense<0.000000e+00> : vector<8x32xf32>
    %11 = tpu.matmul %5, %10, %cst_15 {dimension_numbers = #tpu.dot_dimension_numbers<[1], [0], [0], [1], [0, 0, 1, 1], [], []>} : vector<8x32xf32>, vector<32x32xf32>, vector<8x32xf32> -> vector<8x32xf32>
    %c0_16 = arith.constant 0 : index
    %c0_17 = arith.constant 0 : index
    %12 = vector.load %arg7[%c0_16, %c0_17] : memref<32x32xf32, #tpu.memory_space<vmem>>, vector<32x32xf32>
    %13 = tpu.iota {dimensions = array<i32: 0>} : vector<8x8xi32>
    %14 = tpu.iota {dimensions = array<i32: 1>} : vector<8x8xi32>
    %15 = arith.cmpi sle, %14, %13 : vector<8x8xi32>
    %cst_18 = arith.constant 0.000000e+00 : f32
    %16 = vector.broadcast %cst_18 : f32 to vector<8x32xf32>
    %17 = vector.extract_strided_slice %7 {offsets = [0, 0], sizes = [8, 8], strides = [1, 1]} : vector<8x32xf32> to vector<8x8xf32>
    %18 = vector.extract_strided_slice %9 {offsets = [0, 0], sizes = [8, 8], strides = [1, 1]} : vector<8x32xf32> to vector<8x8xf32>
    %19 = vector.extract_strided_slice %11 {offsets = [0, 0], sizes = [8, 8], strides = [1, 1]} : vector<8x32xf32> to vector<8x8xf32>
    %cst_19 = arith.constant dense<0.000000e+00> : vector<8x8xf32>
    %20 = tpu.matmul %17, %18, %cst_19 {dimension_numbers = #tpu.dot_dimension_numbers<[1], [1], [0], [0], [0, 0, 1, 0], [], []>} : vector<8x8xf32>, vector<8x8xf32>, vector<8x8xf32> -> vector<8x8xf32>
    %cst_20 = arith.constant -1.000000e+30 : f32
    %21 = vector.broadcast %cst_20 : f32 to vector<8x8xf32>
    %22 = arith.select %15, %20, %21 : vector<8x8xi1>, vector<8x8xf32>
    %cst_21 = arith.constant dense<0xFF800000> : vector<8xf32>
    %23 = vector.multi_reduction <maximumf>, %22, %cst_21 [1] : vector<8x8xf32> to vector<8xf32>
    %24 = vector.shape_cast %23 : vector<8xf32> to vector<8x1xf32>
    %25 = vector.broadcast %24 : vector<8x1xf32> to vector<8x8xf32>
    %26 = arith.subf %22, %25 : vector<8x8xf32>
    %27 = math.exp %26 : vector<8x8xf32>
    %cst_22 = arith.constant dense<0.000000e+00> : vector<8xf32>
    %28 = vector.multi_reduction <add>, %27, %cst_22 [1] : vector<8x8xf32> to vector<8xf32>
    %29 = vector.shape_cast %28 : vector<8xf32> to vector<8x1xf32>
    %30 = tpu.reciprocal %29 {approx = true} : vector<8x1xf32> -> vector<8x1xf32>
    %cst_23 = arith.constant dense<0.000000e+00> : vector<8x8xf32>
    %31 = tpu.matmul %27, %19, %cst_23 {dimension_numbers = #tpu.dot_dimension_numbers<[1], [0], [0], [1], [0, 0, 1, 1], [], []>} : vector<8x8xf32>, vector<8x8xf32>, vector<8x8xf32> -> vector<8x8xf32>
    %32 = vector.broadcast %30 : vector<8x1xf32> to vector<8x8xf32>
    %33 = arith.mulf %31, %32 : vector<8x8xf32>
    %34 = vector.extract_strided_slice %12 {offsets = [0, 0], sizes = [8, 32], strides = [1, 1]} : vector<32x32xf32> to vector<8x32xf32>
    %cst_24 = arith.constant dense<0.000000e+00> : vector<8x32xf32>
    %35 = tpu.matmul %33, %34, %cst_24 {dimension_numbers = #tpu.dot_dimension_numbers<[1], [0], [0], [1], [0, 0, 1, 1], [], []>} : vector<8x8xf32>, vector<8x32xf32>, vector<8x32xf32> -> vector<8x32xf32>
    %36 = arith.addf %16, %35 : vector<8x32xf32>
    %37 = vector.extract_strided_slice %7 {offsets = [0, 8], sizes = [8, 8], strides = [1, 1]} : vector<8x32xf32> to vector<8x8xf32>
    %38 = vector.extract_strided_slice %9 {offsets = [0, 8], sizes = [8, 8], strides = [1, 1]} : vector<8x32xf32> to vector<8x8xf32>
    %39 = vector.extract_strided_slice %11 {offsets = [0, 8], sizes = [8, 8], strides = [1, 1]} : vector<8x32xf32> to vector<8x8xf32>
    %cst_25 = arith.constant dense<0.000000e+00> : vector<8x8xf32>
    %40 = tpu.matmul %37, %38, %cst_25 {dimension_numbers = #tpu.dot_dimension_numbers<[1], [1], [0], [0], [0, 0, 1, 0], [], []>} : vector<8x8xf32>, vector<8x8xf32>, vector<8x8xf32> -> vector<8x8xf32>
    %cst_26 = arith.constant -1.000000e+30 : f32
    %41 = vector.broadcast %cst_26 : f32 to vector<8x8xf32>
    %42 = arith.select %15, %40, %41 : vector<8x8xi1>, vector<8x8xf32>
    %cst_27 = arith.constant dense<0xFF800000> : vector<8xf32>
    %43 = vector.multi_reduction <maximumf>, %42, %cst_27 [1] : vector<8x8xf32> to vector<8xf32>
    %44 = vector.shape_cast %43 : vector<8xf32> to vector<8x1xf32>
    %45 = vector.broadcast %44 : vector<8x1xf32> to vector<8x8xf32>
    %46 = arith.subf %42, %45 : vector<8x8xf32>
    %47 = math.exp %46 : vector<8x8xf32>
    %cst_28 = arith.constant dense<0.000000e+00> : vector<8xf32>
    %48 = vector.multi_reduction <add>, %47, %cst_28 [1] : vector<8x8xf32> to vector<8xf32>
    %49 = vector.shape_cast %48 : vector<8xf32> to vector<8x1xf32>
    %50 = tpu.reciprocal %49 {approx = true} : vector<8x1xf32> -> vector<8x1xf32>
    %cst_29 = arith.constant dense<0.000000e+00> : vector<8x8xf32>
    %51 = tpu.matmul %47, %39, %cst_29 {dimension_numbers = #tpu.dot_dimension_numbers<[1], [0], [0], [1], [0, 0, 1, 1], [], []>} : vector<8x8xf32>, vector<8x8xf32>, vector<8x8xf32> -> vector<8x8xf32>
    %52 = vector.broadcast %50 : vector<8x1xf32> to vector<8x8xf32>
    %53 = arith.mulf %51, %52 : vector<8x8xf32>
    %54 = vector.extract_strided_slice %12 {offsets = [8, 0], sizes = [8, 32], strides = [1, 1]} : vector<32x32xf32> to vector<8x32xf32>
    %cst_30 = arith.constant dense<0.000000e+00> : vector<8x32xf32>
    %55 = tpu.matmul %53, %54, %cst_30 {dimension_numbers = #tpu.dot_dimension_numbers<[1], [0], [0], [1], [0, 0, 1, 1], [], []>} : vector<8x8xf32>, vector<8x32xf32>, vector<8x32xf32> -> vector<8x32xf32>
    %56 = arith.addf %36, %55 : vector<8x32xf32>
    %57 = vector.extract_strided_slice %7 {offsets = [0, 16], sizes = [8, 8], strides = [1, 1]} : vector<8x32xf32> to vector<8x8xf32>
    %58 = vector.extract_strided_slice %9 {offsets = [0, 16], sizes = [8, 8], strides = [1, 1]} : vector<8x32xf32> to vector<8x8xf32>
    %59 = vector.extract_strided_slice %11 {offsets = [0, 16], sizes = [8, 8], strides = [1, 1]} : vector<8x32xf32> to vector<8x8xf32>
    %cst_31 = arith.constant dense<0.000000e+00> : vector<8x8xf32>
    %60 = tpu.matmul %57, %58, %cst_31 {dimension_numbers = #tpu.dot_dimension_numbers<[1], [1], [0], [0], [0, 0, 1, 0], [], []>} : vector<8x8xf32>, vector<8x8xf32>, vector<8x8xf32> -> vector<8x8xf32>
    %cst_32 = arith.constant -1.000000e+30 : f32
    %61 = vector.broadcast %cst_32 : f32 to vector<8x8xf32>
    %62 = arith.select %15, %60, %61 : vector<8x8xi1>, vector<8x8xf32>
    %cst_33 = arith.constant dense<0xFF800000> : vector<8xf32>
    %63 = vector.multi_reduction <maximumf>, %62, %cst_33 [1] : vector<8x8xf32> to vector<8xf32>
    %64 = vector.shape_cast %63 : vector<8xf32> to vector<8x1xf32>
    %65 = vector.broadcast %64 : vector<8x1xf32> to vector<8x8xf32>
    %66 = arith.subf %62, %65 : vector<8x8xf32>
    %67 = math.exp %66 : vector<8x8xf32>
    %cst_34 = arith.constant dense<0.000000e+00> : vector<8xf32>
    %68 = vector.multi_reduction <add>, %67, %cst_34 [1] : vector<8x8xf32> to vector<8xf32>
    %69 = vector.shape_cast %68 : vector<8xf32> to vector<8x1xf32>
    %70 = tpu.reciprocal %69 {approx = true} : vector<8x1xf32> -> vector<8x1xf32>
    %cst_35 = arith.constant dense<0.000000e+00> : vector<8x8xf32>
    %71 = tpu.matmul %67, %59, %cst_35 {dimension_numbers = #tpu.dot_dimension_numbers<[1], [0], [0], [1], [0, 0, 1, 1], [], []>} : vector<8x8xf32>, vector<8x8xf32>, vector<8x8xf32> -> vector<8x8xf32>
    %72 = vector.broadcast %70 : vector<8x1xf32> to vector<8x8xf32>
    %73 = arith.mulf %71, %72 : vector<8x8xf32>
    %74 = vector.extract_strided_slice %12 {offsets = [16, 0], sizes = [8, 32], strides = [1, 1]} : vector<32x32xf32> to vector<8x32xf32>
    %cst_36 = arith.constant dense<0.000000e+00> : vector<8x32xf32>
    %75 = tpu.matmul %73, %74, %cst_36 {dimension_numbers = #tpu.dot_dimension_numbers<[1], [0], [0], [1], [0, 0, 1, 1], [], []>} : vector<8x8xf32>, vector<8x32xf32>, vector<8x32xf32> -> vector<8x32xf32>
    %76 = arith.addf %56, %75 : vector<8x32xf32>
    %77 = vector.extract_strided_slice %7 {offsets = [0, 24], sizes = [8, 8], strides = [1, 1]} : vector<8x32xf32> to vector<8x8xf32>
    %78 = vector.extract_strided_slice %9 {offsets = [0, 24], sizes = [8, 8], strides = [1, 1]} : vector<8x32xf32> to vector<8x8xf32>
    %79 = vector.extract_strided_slice %11 {offsets = [0, 24], sizes = [8, 8], strides = [1, 1]} : vector<8x32xf32> to vector<8x8xf32>
    %cst_37 = arith.constant dense<0.000000e+00> : vector<8x8xf32>
    %80 = tpu.matmul %77, %78, %cst_37 {dimension_numbers = #tpu.dot_dimension_numbers<[1], [1], [0], [0], [0, 0, 1, 0], [], []>} : vector<8x8xf32>, vector<8x8xf32>, vector<8x8xf32> -> vector<8x8xf32>
    %cst_38 = arith.constant -1.000000e+30 : f32
    %81 = vector.broadcast %cst_38 : f32 to vector<8x8xf32>
    %82 = arith.select %15, %80, %81 : vector<8x8xi1>, vector<8x8xf32>
    %cst_39 = arith.constant dense<0xFF800000> : vector<8xf32>
    %83 = vector.multi_reduction <maximumf>, %82, %cst_39 [1] : vector<8x8xf32> to vector<8xf32>
    %84 = vector.shape_cast %83 : vector<8xf32> to vector<8x1xf32>
    %85 = vector.broadcast %84 : vector<8x1xf32> to vector<8x8xf32>
    %86 = arith.subf %82, %85 : vector<8x8xf32>
    %87 = math.exp %86 : vector<8x8xf32>
    %cst_40 = arith.constant dense<0.000000e+00> : vector<8xf32>
    %88 = vector.multi_reduction <add>, %87, %cst_40 [1] : vector<8x8xf32> to vector<8xf32>
    %89 = vector.shape_cast %88 : vector<8xf32> to vector<8x1xf32>
    %90 = tpu.reciprocal %89 {approx = true} : vector<8x1xf32> -> vector<8x1xf32>
    %cst_41 = arith.constant dense<0.000000e+00> : vector<8x8xf32>
    %91 = tpu.matmul %87, %79, %cst_41 {dimension_numbers = #tpu.dot_dimension_numbers<[1], [0], [0], [1], [0, 0, 1, 1], [], []>} : vector<8x8xf32>, vector<8x8xf32>, vector<8x8xf32> -> vector<8x8xf32>
    %92 = vector.broadcast %90 : vector<8x1xf32> to vector<8x8xf32>
    %93 = arith.mulf %91, %92 : vector<8x8xf32>
    %94 = vector.extract_strided_slice %12 {offsets = [24, 0], sizes = [8, 32], strides = [1, 1]} : vector<32x32xf32> to vector<8x32xf32>
    %cst_42 = arith.constant dense<0.000000e+00> : vector<8x32xf32>
    %95 = tpu.matmul %93, %94, %cst_42 {dimension_numbers = #tpu.dot_dimension_numbers<[1], [0], [0], [1], [0, 0, 1, 1], [], []>} : vector<8x8xf32>, vector<8x32xf32>, vector<8x32xf32> -> vector<8x32xf32>
    %96 = arith.addf %76, %95 : vector<8x32xf32>
    %c0_43 = arith.constant 0 : index
    %c0_44 = arith.constant 0 : index
    %c0_45 = arith.constant 0 : index
    %97 = vector.load %arg8[%c0_43, %c0_44, %c0_45] : memref<1x8x32xf32, #tpu.memory_space<vmem>>, vector<1x8x32xf32>
    %98 = vector.shape_cast %97 : vector<1x8x32xf32> to vector<8x32xf32>
    %99 = vector.shape_cast %96 : vector<8x32xf32> to vector<1x8x32xf32>
    tpu.vector_store %arg8[%c0_43, %c0_44, %c0_45], %99 {strides = array<i32>} : memref<1x8x32xf32, #tpu.memory_space<vmem>>, vector<1x8x32xf32>,
    return
  }
  func.func @transform_0(%arg0: i32) -> (i32, i32, i32) {
    %c0_i32 = arith.constant 0 : i32
    %c0_i32_0 = arith.constant 0 : i32
    %c0_i32_1 = arith.constant 0 : i32
    return %arg0, %c0_i32, %c0_i32_0 : i32, i32, i32
  }
  func.func @transform_1(%arg0: i32) -> (i32, i32, i32) {
    %c0_i32 = arith.constant 0 : i32
    %c0_i32_0 = arith.constant 0 : i32
    %c0_i32_1 = arith.constant 0 : i32
    return %arg0, %c0_i32, %c0_i32_0 : i32, i32, i32
  }
  func.func @transform_2(%arg0: i32) -> (i32, i32, i32) {
    %c0_i32 = arith.constant 0 : i32
    %c0_i32_0 = arith.constant 0 : i32
    %c0_i32_1 = arith.constant 0 : i32
    return %arg0, %c0_i32, %c0_i32_0 : i32, i32, i32
  }
  func.func @transform_3(%arg0: i32) -> (i32, i32) {
    %c0_i32 = arith.constant 0 : i32
    %c0_i32_0 = arith.constant 0 : i32
    %c0_i32_1 = arith.constant 0 : i32
    return %c0_i32, %c0_i32_0 : i32, i32
  }
  func.func @transform_4(%arg0: i32) -> (i32, i32) {
    %c0_i32 = arith.constant 0 : i32
    %c0_i32_0 = arith.constant 0 : i32
    %c0_i32_1 = arith.constant 0 : i32
    return %c0_i32, %c0_i32_0 : i32, i32
  }
  func.func @transform_5(%arg0: i32) -> (i32, i32) {
    %c0_i32 = arith.constant 0 : i32
    %c0_i32_0 = arith.constant 0 : i32
    %c0_i32_1 = arith.constant 0 : i32
    return %c0_i32, %c0_i32_0 : i32, i32
  }
  func.func @transform_6(%arg0: i32) -> (i32, i32) {
    %c0_i32 = arith.constant 0 : i32
    %c0_i32_0 = arith.constant 0 : i32
    %c0_i32_1 = arith.constant 0 : i32
    return %c0_i32, %c0_i32_0 : i32, i32
  }
  func.func @transform_7(%arg0: i32) -> (i32, i32, i32) {
    %c0_i32 = arith.constant 0 : i32
    %c0_i32_0 = arith.constant 0 : i32
    %c0_i32_1 = arith.constant 0 : i32
    return %arg0, %c0_i32, %c0_i32_0 : i32, i32, i32
  }
}

</mosaic_0001>

<bundles_post_ra>
// kernel: tpu_custom_call.1
= control target key start
LH: loop header
LB: loop body
LE: loop exit
PB: predicated region body
PF: predicated region fallthrough
CT: control target
= control target key end

     0   :  { %s2909_s0 = inlined_call_operand.hbm [shape: f32[2,8,32], index: 0, kind: input, shape index: {}]   ;;  %s2910_s1 = inlined_call_operand.hbm [shape: f32[2,8,32], index: 1, kind: input, shape index: {}]   ;;  %s2911_s2 = inlined_call_operand.hbm [shape: f32[2,8,32], index: 2, kind: input, shape index: {}]   ;;  %s2912_s3 = inlined_call_operand.hbm [shape: f32[32,32], index: 3, kind: input, shape index: {}]   ;;  %s2913_s4 = inlined_call_operand.hbm [shape: f32[32,32], index: 4, kind: input, shape index: {}]   ;;  %s2914_s5 = inlined_call_operand.hbm [shape: f32[32,32], index: 5, kind: input, shape index: {}]   ;;  %s2915_s6 = inlined_call_operand.hbm [shape: f32[32,32], index: 6, kind: input, shape index: {}]   ;;  %s2916_s7 = inlined_call_operand.hbm [shape: f32[2,8,32], index: 7, kind: output, shape index: {}]  }
   0x1   :  { %2940 = sst [smem:[#allocation25_spill]] %s2910_s1 }
   0x2   :  { %2941 = sst [smem:[#allocation26_spill]] %s2912_s3 }
   0x3   :  { %2942 = sst [smem:[#allocation27_spill]] %s2914_s5 }
   0x4   :  { %2943 = sst [smem:[#allocation28_spill]] %s2916_s7 }
   0x5   :  { %12 = vsyncpa [#allocation3], 0 }
   0x6   :  { %14 = vsyncpa [#allocation3 + $0x1], 0 }
   0x7   :  { %15 = vsyncpa [#allocation6], 0 }
   0x8   :  { %17 = vsyncpa [#allocation6 + $0x1], 0 }
   0x9   :  { %18 = vsyncpa [#allocation9], 0 }
   0xa   :  { %19 = vsyncpa [#allocation12], 0 }
   0xb   :  { %20 = vsyncpa [#allocation4], 0 }
   0xc   :  { %22 = vsyncpa [#allocation4 + $0x1], 0  ;;  %s2448_s24 = smov 0   ;;  %s2450_s25 = smov 0  }
   0xd   :  { %s2452_s26 = smov 0   ;;  %s2454_s27 = smov 0  }
   0xe LB: > { %2944 = sst [smem:[#allocation20_spill]] %s2378_s24  ;;  %s2392_s28 = smov [#allocation8]   ;;  %s2390_s27 = sphi %s2454_s27, %s2981_s27   ;;  %s2386_s26 = sphi %s2452_s26, %s2985_s26   ;;  %s2382_s25 = sphi %s2450_s25, %s2984_s25   ;;  %s2378_s24 = sphi %s2448_s24, %s2983_s24  }
   0xf   : > { %2945 = sst [smem:[#allocation21_spill]] %s2390_s27  ;;  %s233_s29 = sshll.u32 %s2392_s28, 4  ;;  %s2474_s29 = int_to_ptr.vmem [resolvable:$true] %s233_s29 }
  0x10   : > { %s2469_s30 = sadd.s32 4294967295, %s2390_s27   ;;  %p1789_p0 = scmp.ge.s32.totalorder %s2390_s27, 1 }
  0x11   : > { %p2926_p1 = scmp.eq.s32.totalorder %s2469_s30, 0  ;;  %p221_p2 = scmp.lt.s32.totalorder %s2390_s27, 3 }
  0x12   : > { %s2393_s9 = smov [#allocation11]   ;;  %s2948_s3 = sld [smem:[#allocation26_spill]] }
  0x13   : > { %p2476_p3 = pnand %p1789_p0, %p221_p2  ;;  %s259_s10 = sshll.u32 %s2393_s9, 4  ;;  %s2489_s10 = int_to_ptr.vmem [resolvable:$true] %s259_s10 }
  0x15   : > { %s2946_s8 = scalar_select %p2476_p3, 1, 0 }
  0x16   : > { %p2013_p5 = pneg %p2476_p3 }
  0x18   : > { %p2485_p6 = pnand %p2013_p5, %p2926_p1  ;;  %s2110_s14 = scalar_lea.hbm %s2948_s3, 512 }
  0x19   : > { %p2111_p7 = scmp.ne.s32.totalorder %s2948_s3, %s2110_s14  ;;  %p2117_p11 = scmp.lt.u32.totalorder %s2110_s14, %s2948_s3 }
  0x1a   : > { %s2947_s11 = scalar_select %p2485_p6, 1, 0 }
  0x1b   : > { %p2499_p8 = pneg %p2485_p6 }
  0x1d   : > { %s2949_s17 = scalar_select %p2499_p8, 1, 0 }
  0x1e   : > { %p2113_p9 = pnand %p2499_p8, %p2111_p7 }
  0x20   : > { %p2114_p10 = pneg %p2113_p9 }
  0x22   : > { %p2119_p12 = pnand %p2117_p11, %p2114_p10 }
  0x24   : > { %2122 = shalt.err (!%p2119_p12)
}
  0x25   : > { %s2123_s20 = scalar_lea.vmem %s2474_s29, 512  ;;  %p2131_p5 = scmp.lt.s32.totalorder %s2474_s29, %s2474_s29 }
  0x26   : > { %p2124_p13 = scmp.ne.s32.totalorder %s2474_s29, %s2123_s20  ;;  %p2132_p4 = scmp.lt.s32.totalorder %s2123_s20, %s2123_s20 }
  0x28   : > { %p2126_p0 = pnand %p2124_p13, %p2499_p8  ;;  %p2133_p7 = por %p2132_p4, %p2131_p5 }
  0x2a   : > { %p2127_p2 = pneg %p2126_p0 }
  0x2c   : > { %p2134_p9 = pnand %p2133_p7, %p2127_p2 }
  0x2e   : > { %2137 = shalt.err (!%p2134_p9)
}
  0x2f   : > { %s2919_s21 = smov 128   ;;  %s2921_s22 = smov 8  }
  0x30   : > { %2016 = dma.hbm_to_vmem [thread:$0]  (!%p2485_p6), %s2948_s3, 512, %s2474_s29, [#allocation9], %s2919_s21, %s2919_s21, %s2921_s22  }
  0x31   : > { %s2950_s5 = sld [smem:[#allocation27_spill]] }
  0x37   : > { %s2138_s13 = scalar_lea.hbm %s2950_s5, 512 }
  0x38   : > { %p2139_p4 = scmp.ne.s32.totalorder %s2950_s5, %s2138_s13  ;;  %p2145_p12 = scmp.lt.u32.totalorder %s2138_s13, %s2950_s5 }
  0x3a   : > { %p2141_p10 = pnand %p2139_p4, %p2499_p8 }
  0x3c   : > { %p2142_p11 = pneg %p2141_p10 }
  0x3e   : > { %p2147_p13 = pnand %p2145_p12, %p2142_p11 }
  0x40   : > { %2150 = shalt.err (!%p2147_p13)
}
  0x41   : > { %s2151_s29 = scalar_lea.vmem %s2489_s10, 512  ;;  %p2159_p7 = scmp.lt.s32.totalorder %s2489_s10, %s2489_s10 }
  0x42   : > { %p2152_p0 = scmp.ne.s32.totalorder %s2489_s10, %s2151_s29  ;;  %p2160_p9 = scmp.lt.s32.totalorder %s2151_s29, %s2151_s29 }
  0x44   : > { %p2154_p2 = pnand %p2152_p0, %p2499_p8  ;;  %p2161_p4 = por %p2160_p9, %p2159_p7 }
  0x46   : > { %p2155_p5 = pneg %p2154_p2 }
  0x48   : > { %p2162_p10 = pnand %p2161_p4, %p2155_p5 }
  0x4a   : > { %2165 = shalt.err (!%p2162_p10)
}
  0x4b   : > { %2022 = dma.hbm_to_vmem [thread:$0]  (!%p2485_p6), %s2950_s5, 512, %s2489_s10, [#allocation12], %s2919_s21, %s2919_s21, %s2921_s22  }
  0x4c   : > { %s1788_s23 = sadd.s32 4294967294, %s2390_s27   ;;  %s2551_s28 = sadd.s32 1, %s2390_s27  }
  0x4d   : > { %2951 = sst [smem:[#allocation22_spill]] %s2551_s28  ;;  %s32_s9 = ssub.s32 %s2390_s27, %s2551_s28 }
  0x4e   : > { %s35_s12 = sadd.s32 1, %s2386_s26  ;;  %p33_p11 = scmp.eq.s32.totalorder %s32_s9, 0 }
  0x4f   : > { %p42_p12 = scmp.ne.s32.totalorder %s2386_s26, %s2382_s25  ;;  %p43_p13 = scmp.eq.s32.totalorder %s2390_s27, 0 }
  0x50   : > { %p48_p0 = scmp.ne.s32.totalorder %s2382_s25, %s2378_s24  ;;  %p208_p7 = scmp.eq.s32.totalorder %s2469_s30, 1 }
  0x51   : > { %s2562_s13 = scalar_select %p33_p11, %s2386_s26, %s35_s12  }
  0x52   : > { %p44_p2 = por %p43_p13, %p42_p12  ;;  %p2566_p5 = por %p2926_p1, %p48_p0 }
  0x53   : > { %2952 = sst [smem:[#allocation23_spill]] %s2562_s13  ;;  %p214_p9 = scmp.eq.s32.totalorder %s1788_s23, 1 }
  0x54   : > { %s2953_s14 = scalar_select %p2566_p5, 1, 0 }
  0x55   : > { %p2044_p4 = scmp.lt.s32.totalorder %s2390_s27, 2  ;;  %s2918_s10 = sand.u32 1, %s2386_s26  }
  0x56   : > { %p2573_p10 = por %p208_p7, %p42_p12  ;;  %p2577_p3 = por %p214_p9, %p48_p0 }
  0x57   : > { %s2583_s18 = sshll.u32 %s2918_s10, 3  ;;  %s2586_s29 = sshll.u32 %s2390_s27, 7 }
  0x58   : > { %s2954_s15 = scalar_select %p2573_p10, 1, 0 }
  0x59   : > { %s2955_s16 = scalar_select %p2577_p3, 1, 0 }
  0x5a   : > { %p2588_p11 = pnand %p2044_p4, %p44_p2  ;;  %s304_s20 = sand.u32 1, %s2390_s27  }
  0x5b   : > { %2956 = sst [smem:[#allocation24_spill]] %s2955_s16  ;;  %s308_s10 = scalar_lea.vmem [#allocation5], %s2583_s18 }
  0x5c   : > { %s2957_s19 = scalar_select %p2588_p11, 1, 0 }
  0x5d   : > { %s2958_s1 = sld [smem:[#allocation25_spill]]  ;;  %s315_s21 = sshll.u32 %s308_s10, 4  ;;  %s2600_s21 = int_to_ptr.vmem [resolvable:$true] %s315_s21 }
  0x5e   : > { %s2396_s22 = smov [#allocation10]   ;;  %s2604_s5 = scalar_lea.sflag [#allocation6], %s304_s20 }
  0x5f   : > { %s2602_s3 = sshll.u32 %s2396_s22, 4  ;;  %p2610_p13 = pneg %p2588_p11  ;;  %s247_s3 = int_to_ptr.vmem [resolvable:$true] %s2602_s3 }
  0x61   : > { %s2959_s23 = scalar_select %p2610_p13, 1, 0 }
  0x63   : > { %s2597_s12 = scalar_lea.hbm %s2958_s1, %s2586_s29  ;;  %s2171_s28 = scalar_lea.hbm %s2958_s1, 256 }
  0x64   : > { %s2166_s13 = scalar_lea.hbm %s2597_s12, 128  ;;  %p2172_p7 = scmp.lt.u32.totalorder %s2597_s12, %s2958_s1 }
  0x65   : > { %p2167_p12 = scmp.ne.s32.totalorder %s2597_s12, %s2166_s13  ;;  %p2173_p9 = scmp.lt.u32.totalorder %s2171_s28, %s2166_s13 }
  0x66   : > { %p2175_p1 = scmp.lt.u32.totalorder %s2166_s13, %s2597_s12 }
  0x67   : > { %p2169_p0 = pnand %p2610_p13, %p2167_p12  ;;  %p2174_p4 = por %p2173_p9, %p2172_p7 }
  0x69   : > { %p2170_p2 = pneg %p2169_p0  ;;  %p2176_p3 = por %p2175_p1, %p2174_p4 }
  0x6b   : > { %p2177_p10 = pnand %p2176_p3, %p2170_p2 }
  0x6d   : > { %2180 = shalt.err (!%p2177_p10)
}
  0x6e   : > { %s2181_s20 = scalar_lea.vmem %s2600_s21, 128  ;;  %s2397_s9 = smov [#allocation5]  }
  0x6f   : > { %p2182_p12 = scmp.ne.s32.totalorder %s2600_s21, %s2181_s20  ;;  %s2186_s10 = sshll.u32 %s2397_s9, 4  ;;  %s2187_s10 = int_to_ptr.vmem [resolvable:$false] %s2186_s10 }
  0x70   : > { %s2188_s27 = scalar_lea.vmem %s2187_s10, 256  ;;  %p2189_p6 = scmp.lt.s32.totalorder %s2600_s21, %s2187_s10 }
  0x71   : > { %p2184_p0 = pnand %p2182_p12, %p2610_p13  ;;  %p2190_p8 = scmp.lt.s32.totalorder %s2188_s27, %s2181_s20 }
  0x73   : > { %p2185_p5 = pneg %p2184_p0  ;;  %p2191_p7 = por %p2190_p8, %p2189_p6 }
  0x75   : > { %p2192_p9 = pnand %p2191_p7, %p2185_p5 }
  0x77   : > { %2195 = shalt.err (!%p2192_p9)
}
  0x78   : > { %2032 = dma.hbm_to_vmem [thread:$0]  (!%p2588_p11), %s2597_s12, 128, %s2600_s21, %s2604_s5  }
  0x79   : > { %s2196_s22 = scalar_lea.hbm %s2913_s4, 512  ;;  %p2960_p3 = scmp.ne.s32.totalorder %s2949_s17, 0 }
  0x7a   : > { %p2197_p1 = scmp.ne.s32.totalorder %s2913_s4, %s2196_s22  ;;  %p2203_p5 = scmp.lt.u32.totalorder %s2196_s22, %s2913_s4 }
  0x7c   : > { %p2199_p6 = pnand %p2197_p1, %p2960_p3 }
  0x7e   : > { %p2200_p8 = pneg %p2199_p6 }
  0x80   : > { %p2205_p10 = pnand %p2203_p5, %p2200_p8 }
  0x82   : > { %2208 = shalt.err (!%p2205_p10)
}
  0x83   : > { %s2209_s27 = scalar_lea.vmem %s247_s3, 512  ;;  %p2217_p0 = scmp.lt.s32.totalorder %s247_s3, %s247_s3 }
  0x84   : > { %p2210_p2 = scmp.ne.s32.totalorder %s247_s3, %s2209_s27  ;;  %p2218_p7 = scmp.lt.s32.totalorder %s2209_s27, %s2209_s27 }
  0x86   : > { %p2212_p4 = pnand %p2210_p2, %p2960_p3  ;;  %p2219_p9 = por %p2218_p7, %p2217_p0 }
  0x88   : > { %p2213_p12 = pneg %p2212_p4 }
  0x8a   : > { %p2220_p11 = pnand %p2219_p9, %p2213_p12 }
  0x8c   : > { %2223 = shalt.err (!%p2220_p11)
}
  0x8d   : > { %p2961_p1 = scmp.ne.s32.totalorder %s2947_s11, 0  ;;  %s2962_s1 = smov 8  }
  0x8e   : > { %s2963_s21 = smov 128   ;;  %s2398_s13 = smov [#allocation13]  }
  0x8f   : > { %2019 = dma.hbm_to_vmem [thread:$0]  (!%p2961_p1), %s2913_s4, 512, %s247_s3, [#allocation9], %s2963_s21, %s2963_s21, %s2962_s1  }
  0x90   : > { %s272_s22 = sshll.u32 %s2398_s13, 4  ;;  %s2224_s10 = scalar_lea.hbm %s2915_s6, 512  ;;  %s273_s22 = int_to_ptr.vmem [resolvable:$true] %s272_s22 }
  0x91   : > { %p2225_p11 = scmp.ne.s32.totalorder %s2915_s6, %s2224_s10  ;;  %p2231_p5 = scmp.lt.u32.totalorder %s2224_s10, %s2915_s6 }
  0x93   : > { %p2227_p6 = pnand %p2225_p11, %p2960_p3 }
  0x95   : > { %p2228_p8 = pneg %p2227_p6 }
  0x97   : > { %p2233_p10 = pnand %p2231_p5, %p2228_p8 }
  0x99   : > { %2236 = shalt.err (!%p2233_p10)
}
  0x9a   : > { %s2237_s3 = scalar_lea.vmem %s273_s22, 512  ;;  %p2245_p0 = scmp.lt.s32.totalorder %s273_s22, %s273_s22 }
  0x9b   : > { %p2238_p2 = scmp.ne.s32.totalorder %s273_s22, %s2237_s3  ;;  %p2246_p7 = scmp.lt.s32.totalorder %s2237_s3, %s2237_s3 }
  0x9d   : > { %p2240_p4 = pnand %p2238_p2, %p2960_p3  ;;  %p2247_p9 = por %p2246_p7, %p2245_p0 }
  0x9f   : > { %p2241_p12 = pneg %p2240_p4 }
  0xa1   : > { %p2248_p13 = pnand %p2247_p9, %p2241_p12 }
  0xa3   : > { %2251 = shalt.err (!%p2248_p13)
}
  0xa4   : > { %2025 = dma.hbm_to_vmem [thread:$0]  (!%p2961_p1), %s2915_s6, 512, %s273_s22, [#allocation12], %s2963_s21, %s2963_s21, %s2962_s1  }
  0xa5   : > { %s2681_s12 = scalar_lea.hbm %s2909_s0, %s2586_s29  ;;  %s290_s11 = scalar_lea.vmem [#allocation2], %s2583_s18 }
  0xa6   : > { %s297_s28 = sshll.u32 %s290_s11, 4  ;;  %s2964_s13 = sand.u32 1, %s2386_s26   ;;  %s298_s28 = int_to_ptr.vmem [resolvable:$true] %s297_s28 }
  0xa7   : > { %s287_s9 = scalar_lea.sflag [#allocation3], %s2964_s13  ;;  %s2252_s20 = scalar_lea.hbm %s2681_s12, 128 }
  0xa8   : > { %p2253_p13 = scmp.ne.s32.totalorder %s2681_s12, %s2252_s20  ;;  %p2965_p3 = scmp.ne.s32.totalorder %s2959_s23, 0 }
  0xa9   : > { %s2257_s22 = scalar_lea.hbm %s2909_s0, 256  ;;  %p2258_p1 = scmp.lt.u32.totalorder %s2681_s12, %s2909_s0 }
  0xaa   : > { %p2255_p11 = pnand %p2253_p13, %p2965_p3  ;;  %p2259_p8 = scmp.lt.u32.totalorder %s2257_s22, %s2252_s20 }
  0xab   : > { %p2261_p10 = scmp.lt.u32.totalorder %s2252_s20, %s2681_s12 }
  0xac   : > { %p2256_p6 = pneg %p2255_p11  ;;  %p2260_p5 = por %p2259_p8, %p2258_p1 }
  0xae   : > { %p2262_p2 = por %p2261_p10, %p2260_p5 }
  0xb0   : > { %p2263_p4 = pnand %p2262_p2, %p2256_p6 }
  0xb2   : > { %2266 = shalt.err (!%p2263_p4)
}
  0xb3   : > { %s2267_s3 = scalar_lea.vmem %s298_s28, 128  ;;  %s2399_s7 = smov [#allocation2]  }
  0xb4   : > { %p2268_p12 = scmp.ne.s32.totalorder %s298_s28, %s2267_s3  ;;  %s2272_s24 = sshll.u32 %s2399_s7, 4  ;;  %s2273_s24 = int_to_ptr.vmem [resolvable:$false] %s2272_s24 }
  0xb5   : > { %s2274_s17 = scalar_lea.vmem %s2273_s24, 256  ;;  %p2275_p9 = scmp.lt.s32.totalorder %s298_s28, %s2273_s24 }
  0xb6   : > { %p2270_p0 = pnand %p2268_p12, %p2965_p3  ;;  %p2276_p13 = scmp.lt.s32.totalorder %s2274_s17, %s2267_s3 }
  0xb8   : > { %p2271_p7 = pneg %p2270_p0  ;;  %p2277_p11 = por %p2276_p13, %p2275_p9 }
  0xba   : > { %p2278_p1 = pnand %p2277_p11, %p2271_p7 }
  0xbc   : > { %2281 = shalt.err (!%p2278_p1)
}
  0xbd   : > { %p2966_p8 = scmp.ne.s32.totalorder %s2957_s19, 0  ;;  %s2707_s13 = scalar_lea.hbm %s2911_s2, %s2586_s29 }
  0xbe   : > { %s326_s20 = scalar_lea.vmem [#allocation7], %s2583_s18  ;;  %s2282_s21 = scalar_lea.hbm %s2707_s13, 128 }
  0xbf   : > { %2029 = dma.hbm_to_vmem [thread:$0]  (!%p2966_p8), %s2681_s12, 128, %s298_s28, %s287_s9  }
  0xc0   : > { %s333_s1 = sshll.u32 %s326_s20, 4  ;;  %p2283_p6 = scmp.ne.s32.totalorder %s2707_s13, %s2282_s21  ;;  %s334_s1 = int_to_ptr.vmem [resolvable:$true] %s333_s1 }
  0xc1   : > { %s2287_s12 = scalar_lea.hbm %s2911_s2, 256  ;;  %p2288_p2 = scmp.lt.u32.totalorder %s2707_s13, %s2911_s2 }
  0xc2   : > { %p2285_p5 = pnand %p2283_p6, %p2965_p3  ;;  %p2289_p4 = scmp.lt.u32.totalorder %s2287_s12, %s2282_s21 }
  0xc3   : > { %p2291_p0 = scmp.lt.u32.totalorder %s2282_s21, %s2707_s13 }
  0xc4   : > { %p2286_p10 = pneg %p2285_p5  ;;  %p2290_p12 = por %p2289_p4, %p2288_p2 }
  0xc6   : > { %p2292_p7 = por %p2291_p0, %p2290_p12 }
  0xc8   : > { %p2293_p9 = pnand %p2292_p7, %p2286_p10 }
  0xca   : > { %2296 = shalt.err (!%p2293_p9)
}
  0xcb   : > { %s2297_s18 = scalar_lea.vmem %s334_s1, 128  ;;  %s2400_s29 = smov [#allocation7]  }
  0xcc   : > { %p2298_p13 = scmp.ne.s32.totalorder %s334_s1, %s2297_s18  ;;  %s2302_s27 = sshll.u32 %s2400_s29, 4  ;;  %s2303_s27 = int_to_ptr.vmem [resolvable:$false] %s2302_s27 }
  0xcd   : > { %s2304_s3 = scalar_lea.vmem %s2303_s27, 256  ;;  %p2305_p6 = scmp.lt.s32.totalorder %s334_s1, %s2303_s27 }
  0xce   : > { %p2300_p11 = pnand %p2298_p13, %p2965_p3  ;;  %p2306_p5 = scmp.lt.s32.totalorder %s2304_s3, %s2297_s18 }
  0xd0   : > { %p2301_p1 = pneg %p2300_p11  ;;  %p2307_p8 = por %p2306_p5, %p2305_p6 }
  0xd2   : > { %p2308_p2 = pnand %p2307_p8, %p2301_p1 }
  0xd4   : > { %2311 = shalt.err (!%p2308_p2)
}
  0xd5   : > { %p2967_p4 = scmp.ne.s32.totalorder %s2957_s19, 0  ;;  %p2968_p10 = scmp.ne.s32.totalorder %s2946_s8, 0 }
  0xd6   : > { %s2731_s23 = sand.u32 (!%p2968_p10), 1, %s2382_s25   ;;  %p2969_p3 = scmp.ne.s32.totalorder (!%p2968_p10), %s2953_s14, 0 }
  0xd7   : > { %2035 = dma.hbm_to_vmem [thread:$0]  (!%p2967_p4), %s2707_s13, 128, %s334_s1, %s2604_s5  }
  0xd8   : > { %342 = sbr.rel (%p2968_p10) target bundleno = 2394 (0x95a), region = 48  ;;  %s2734_s7 = sshll.u32 (!%p2968_p10), %s2731_s23, 3 }
  0xd9   : > { %s345_s24 = scalar_lea.sflag (!%p2968_p10), [#allocation3], %s2731_s23  ;;  %s348_s17 = scalar_lea.vmem (!%p2968_p10), [#allocation2], %s2734_s7 }
  0xdf   : > { %2357 = dma.done.wait (%p2969_p3), %s345_s24, 128  }
  0xe0   : > { %2359 = vsyncadd (%p2969_p3), %s345_s24, 4294967168  ;;  %s353_s5 = sand.u32 1, %s2469_s30   ;;  %s357_s19 = scalar_lea.vmem [#allocation5], %s2734_s7 }
  0xe1   : > { %s354_s8 = scalar_lea.sflag [#allocation6], %s353_s5 }
  0xe2   : > { %2361 = dma.done.wait (%p2969_p3), %s354_s8, 256  }
  0xe3   : > { %2363 = vsyncadd (%p2969_p3), %s354_s8, 4294967040  ;;  %s366_s16 = scalar_lea.vmem [#allocation7], %s2734_s7  ;;  %p2970_p8 = scmp.eq.s32.totalorder %s2469_s30, 0 }
  0xe5   : > { %2365 = dma.done.wait (%p2970_p8), [#allocation9], 1024   ;;  %p2971_p12 = pmov %p2970_p8 }
  0xe6   : > { %p2972_p0 = pmov %p2970_p8 }
  0xe7   : > { %2367 = vsyncadd (%p2971_p12), [#allocation9], 4294966272 }
  0xe8   : > { %2369 = dma.done.wait (%p2972_p0), [#allocation12], 1024   ;;  %p2973_p7 = pmov %p2972_p0 }
  0xe9   : > { %v2401_v0 = vmov 0.0|0.0   ;;  %vm2402_vm0 = vmmov 0   ;;  %v2403_v1 = vmov 0.0   ;;  %v504_v2 = vld [vmem:[#allocation10] sm:$0xff]  ;;  %v505_v3 = vld [vmem:[#allocation10 + $0x8] sm:$0xff]  ;;  %v506_v7 = vld [vmem:[#allocation10 + $0x10] sm:$0xff]  ;;  %v662_v29 = vlaneseq }
  0xea   : > { %2371 = vsyncadd (%p2973_p7), [#allocation12], 4294966272  ;;  %1971 = vmatprep.subr.bf16.mxu1 %v2401_v0  ;;  %1965 = vmatprep.subr.bf16.mxu0 %v2401_v0  ;;  %v426_v4 = vld [vmem:[#allocation8] sm:$0xff]  ;;  %v1972_v5 = vpack.c.bf16 %v505_v3, %v504_v2  ;;  %v427_v6 = vld [vmem:[#allocation8 + $0x8] sm:$0xff]  ;;  %vm430_vm1 = vcmask 261120   ;;  %vm667_vm2 = vcmask 64512  }
  0xeb   : > { %1891 = vmatprep.mubr.msk.f32.mxu1 %vm2402_vm0, %v2403_v1  ;;  %1880 = vmatprep.mubr.msk.f32.mxu0 %vm2402_vm0, %v2403_v1  ;;  %v507_v8 = vld [vmem:[#allocation10 + $0x18] sm:$0xff]  ;;  %v1966_v9 = vpack.c.bf16 %v427_v6, %v426_v4  ;;  %v428_v10 = vld [vmem:[#allocation8 + $0x10] sm:$0xff]  ;;  %v424_v14 = vld [vmem:[%s357_s19] sm:$0xff]  ;;  %s2404_s14 = smov 120   ;;  %v2787_v30 = vshrl.u32 %v662_v29, 7  ;;  %v2789_v31 = vand.u32 127, %v662_v29 }
  0xec   : > { %v429_v11 = vld [vmem:[#allocation8 + $0x18] sm:$0xff]  ;;  %1973 = vmatpush3.bf16.msra.mxu1 %v1972_v5  ;;  %v1975_v12 = vpack.c.bf16 %v507_v8, %v506_v7  ;;  %v581_v16 = vld [vmem:[#allocation11] sm:$0xff]  ;;  %v582_v17 = vld [vmem:[#allocation11 + $0x8] sm:$0xff]  ;;  %s2405_s11 = smov 112   ;;  %s2406_s13 = smov 104  }
  0xed   : > { %1967 = vmatpush3.bf16.msra.mxu0 %v1966_v9  ;;  %1974 = vmatprep.subr.bf16.mxu1 %v2401_v0  ;;  %v1969_v13 = vpack.c.bf16 %v429_v11, %v428_v10  ;;  %v423_v15 = vld [vmem:[%s348_s17] sm:$0xff]  ;;  %v1978_v19 = vpack.c.bf16 %v582_v17, %v581_v16  ;;  %vm666_vm3 = vcmp.le.s32.totalorder %v2789_v31, %v2787_v30  ;;  %v659_v57 = vld [vmem:[#allocation13 + $0x8] sm:$0xff]  ;;  %v658_v7 = vld [vmem:[#allocation13] sm:$0xff]  ;;  %s1830_s20 = sshll.u32 %s2469_s30, 7  ;;  %s422_s1 = scalar_lea.vmem [#allocation14], %s2734_s7 }
  0xee   : > { %1968 = vmatprep.subr.bf16.mxu0 %v2401_v0  ;;  %v583_v18 = vld [vmem:[#allocation11 + $0x10] sm:$0xff]  ;;  %v584_v20 = vld [vmem:[#allocation11 + $0x18] sm:$0xff]  ;;  %s1637_s21 = sshll.u32 %s422_s1, 4  ;;  %s2974_s12 = sld [smem:[#allocation28_spill]]  ;;  %s2866_s21 = int_to_ptr.vmem [resolvable:$true] %s1637_s21 }
  0xef   : > { %v1981_v21 = vpack.c.bf16 %v584_v20, %v583_v18  ;;  %v425_v22 = vld [vmem:[%s366_s16] sm:$0xff]  ;;  %s1624_s9 = scalar_lea.sflag [#allocation4], %s2731_s23  ;;  %s2312_s18 = scalar_lea.vmem %s2866_s21, 128 }
  0xf0   : > { %1976 = vmatpush3.bf16.msra.mxu1 %v1975_v12  ;;  %v660_v16 = vld [vmem:[#allocation13 + $0x10] sm:$0xff]  ;;  %p2313_p9 = scmp.ne.s32.totalorder %s2866_s21, %s2312_s18  ;;  %p2975_p13 = scmp.ne.s32.totalorder %s2954_s15, 0 }
  0xf1   : > { %1970 = vmatpush3.bf16.msra.mxu0 %v1969_v13  ;;  %1905 = vmatprep.subr.mxu1 %v2403_v1  ;;  %s2407_s30 = smov [#allocation14]  }
  0xf2   : > { %1977 = vmatprep.subr.bf16.mxu0 %v2401_v0  ;;  %p2314_p11 = pnand %p2313_p9, %p2975_p13  ;;  %s2316_s29 = sshll.u32 %s2407_s30, 4  ;;  %s2317_s29 = int_to_ptr.vmem [resolvable:$false] %s2316_s29 }
  0xf3   : > { %1892 = vmatmul.mubr.msk.f32.vlgmr.msra.gmra.mrb[0].mxu1 %vm430_vm1, %v424_v14  ;;  %s2318_s27 = scalar_lea.vmem %s2317_s29, 256  ;;  %p2319_p6 = scmp.lt.s32.totalorder %s2866_s21, %s2317_s29 }
  0xf4   : > { %1881 = vmatmul.mubr.msk.f32.vlgmr.msra.gmra.mrb[0].mxu0 %vm430_vm1, %v423_v15  ;;  %1907 = vmatprep.mubr.msk.f32.mxu1 %vm2402_vm0, %v2403_v1  ;;  %s2864_s28 = scalar_lea.hbm %s2974_s12, %s1830_s20  ;;  %p2315_p1 = pneg %p2314_p11 }
  0xf5   : > { %1902 = vmatprep.mubr.msk.f32.mxu0 %vm2402_vm0, %v2403_v1  ;;  %1979 = vmatpush3.bf16.msra.mxu0 %v1978_v19  ;;  %p2320_p5 = scmp.lt.s32.totalorder %s2318_s27, %s2312_s18 }
  0xf6   : > { %1980 = vmatprep.subr.bf16.mxu0 %v2401_v0 }
  0xf7   : > { %p2321_p2 = por %p2320_p5, %p2319_p6 }
  0xf9   : > { %1982 = vmatpush3.bf16.msra.mxu0 %v1981_v21  ;;  %p2322_p4 = pnand %p2321_p2, %p2315_p1 }
  0xfa   : > { %1925 = vmatprep.subr.mxu0 %v2403_v1 }
  0xfc   : > { %1903 = vmatmul.mubr.msk.f32.vlgmr.msra.gmra.mrb[2].mxu0 %vm430_vm1, %v425_v22 }
  0xfd   : > { %1927 = vmatprep.mubr.msk.f32.mxu0 %vm2402_vm0, %v2403_v1  ;;  %1926 = vmatpush3.msra.mxu0 %v659_v57 }
  0xfe   : > { %1930 = vmatprep.subr.mxu0 %v2403_v1 }
 0x1c6   : > { %v577_v23 = vpop.f32.mrb[0].mxu1 }
 0x1c7   : > { %v1893_v24 = vpop.f32.mrb[1].mxu1  ;;  %1906 = vmatpush3.xpose.msk.msra.mxu1 %vm667_vm2, %v577_v23  ;;  %v500_v25 = vpop.f32.mrb[0].mxu0 }
 0x1c8   : > { %v1882_v26 = vpop.f32.mrb[1].mxu0  ;;  %829 = vrot.lane.b32.xlu1 %v500_v25, %s2404_s14  ;;  %1910 = vmatprep.subr.mxu1 %v2403_v1 }
 0x1ca   : > { %1908 = vmatmul.mubr.msk.f32.vlgmr.msra.gmra.mrb[2].mxu1 %vm667_vm2, %v500_v25 }
 0x1cb   : > { %1912 = vmatprep.mubr.msk.f32.mxu1 %vm2402_vm0, %v2403_v1 }
 0x1cf   : > { %v2783_v27 = vpop.f32.mrb[2].mxu0 }
 0x1d0   : > { %v1904_v28 = vpop.f32.mrb[3].mxu0  ;;  %1911 = vmatpush3.msra.mxu1 %v2783_v27 }
 0x1d1   : > { %1915 = vmatprep.subr.mxu1 %v2403_v1 }
 0x23a   : > { %v830_v41 = vpop.permute.xlu1 %829 }
 0x29d   : > { %v740_v32 = vpop.f32.mrb[2].mxu1 }
 0x29e   : > { %v744_v33 = vsel %vm666_vm3, %v740_v32, -1e+30  ;;  %v1909_v34 = vpop.f32.mrb[3].mxu1 }
 0x29f   : > { %v745_v35 = vsel %vm667_vm2, %v744_v33, -inf }
 0x2a0   : > { %746 = vmax.xlane.f32.xlu0 %v745_v35 }
 0x2b6   : > { %831 = vrot.lane.b32.xlu0 %v577_v23, %s2404_s14 }
 0x2ba   : > { %919 = vrot.lane.b32.xlu0 %v2783_v27, %s2404_s14 }
 0x2be   : > { %1144 = vrot.lane.b32.xlu0 %v577_v23, %s2405_s11 }
 0x2c2   : > { %1142 = vrot.lane.b32.xlu0 %v500_v25, %s2405_s11 }
 0x32d   : > { %v747_v36 = vpop.xlane.xlu0 %746 }
 0x32e   : > { %v748_v37 = vsub.f32 %v744_v33, %v747_v36 }
 0x330   : > { %v749_v38 = vmul.f32 1.442695, %v748_v37 }
 0x331   : > { %v832_v39 = vpop.permute.xlu0 %831 }
 0x332   : > { %2094 = vpow2.f32 %v749_v38 }
 0x335   : > { %v920_v42 = vpop.permute.xlu0 %919 }
 0x339   : > { %v1145_v52 = vpop.permute.xlu0 %1144 }
 0x33c   : > { %v2095_v40 = vpop.eup %2094 }
 0x33d   : > { %1913 = vmatmul.mubr.msk.f32.vlgmr.msra.gmra.mrb[4].mxu1 %vm667_vm2, %v2095_v40  ;;  %v1143_v55 = vpop.permute.xlu0 %1142  ;;  %v751_v6 = vsel %vm667_vm2, %v2095_v40, 0.0 }
 0x33e   : > { %1916 = vmatpush3.xpose.msk.msra.mxu1 %vm667_vm2, %v832_v39  ;;  %1917 = vmatprep.mubr.msk.f32.mxu1 %vm2402_vm0, %v2403_v1 }
 0x33f   : > { %1920 = vmatprep.subr.mxu1 %v2403_v1 }
 0x341   : > { %1918 = vmatmul.mubr.msk.f32.vlgmr.msra.gmra.mrb[6].mxu1 %vm667_vm2, %v830_v41 }
 0x342   : > { %1921 = vmatpush3.msra.mxu1 %v920_v42  ;;  %1922 = vmatprep.mubr.msk.f32.mxu1 %vm2402_vm0, %v2403_v1 }
 0x343   : > { %1935 = vmatprep.subr.mxu1 %v2403_v1 }
 0x410   : > { %v824_v43 = vpop.f32.mrb[4].mxu1 }
 0x411   : > { %v1914_v44 = vpop.f32.mrb[5].mxu1 }
 0x414   : > { %v903_v45 = vpop.f32.mrb[6].mxu1 }
 0x415   : > { %v907_v46 = vsel %vm666_vm3, %v903_v45, -1e+30  ;;  %v1919_v47 = vpop.f32.mrb[7].mxu1 }
 0x416   : > { %v908_v48 = vsel %vm667_vm2, %v907_v46, -inf }
 0x417   : > { %909 = vmax.xlane.f32.xlu1 %v908_v48 }
 0x428   : > { %1231 = vrot.lane.b32.xlu1 %v2783_v27, %s2405_s11 }
 0x42c   : > { %1384 = vrot.lane.b32.xlu1 %v577_v23, %s2406_s13 }
 0x430   : > { %1382 = vrot.lane.b32.xlu1 %v500_v25, %s2406_s13 }
 0x4a4   : > { %v910_v49 = vpop.xlane.xlu1 %909 }
 0x4a5   : > { %v911_v50 = vsub.f32 %v907_v46, %v910_v49 }
 0x4a7   : > { %v912_v51 = vmul.f32 1.442695, %v911_v50 }
 0x4a8   : > { %v1232_v56 = vpop.permute.xlu1 %1231 }
 0x4a9   : > { %2096 = vpow2.f32 %v912_v51 }
 0x4ac   : > { %v1385_v58 = vpop.permute.xlu1 %1384 }
 0x4b0   : > { %v1383_v59 = vpop.permute.xlu1 %1382 }
 0x4b3   : > { %v2097_v53 = vpop.eup %2096 }
 0x4b4   : > { %1923 = vmatmul.mubr.msk.f32.vlgmr.msra.gmra.mrb[8].mxu1 %vm667_vm2, %v2097_v53  ;;  %v914_v54 = vsel %vm667_vm2, %v2097_v53, 0.0 }
 0x4b5   : > { %1936 = vmatpush3.xpose.msk.msra.mxu1 %vm667_vm2, %v1145_v52  ;;  %915 = vadd.xlane.f32.xlu1 %v914_v54 }
 0x4b6   : > { %1937 = vmatprep.mubr.msk.f32.mxu1 %vm2402_vm0, %v2403_v1  ;;  %1940 = vmatprep.subr.mxu1 %v2403_v1 }
 0x4b8   : > { %1938 = vmatmul.mubr.msk.f32.vlgmr.msra.gmra.mrb[10].mxu1 %vm667_vm2, %v1143_v55 }
 0x4b9   : > { %1941 = vmatpush3.msra.mxu1 %v1232_v56  ;;  %1942 = vmatprep.mubr.msk.f32.mxu1 %vm2402_vm0, %v2403_v1 }
 0x4ba   : > { %1950 = vmatprep.subr.mxu1 %v2403_v1 }
 0x542   : > { %v916_v60 = vpop.xlane.xlu1 %915 }
 0x543   : > { %2098 = vrcp.f32 %v916_v60 }
 0x54d   : > { %v2099_v61 = vpop.eup %2098 }
 0x587   : > { %v991_v62 = vpop.f32.mrb[8].mxu1 }
 0x588   : > { %v995_v63 = vmul.f32 %v2099_v61, %v991_v62  ;;  %v1924_v0 = vpop.f32.mrb[9].mxu1 }
 0x58a   : > { %1928 = vmatmul.mubr.msk.f32.vlgmr.msra.gmra.mrb[4].mxu0 %vm667_vm2, %v995_v63 }
 0x58b   : > { %v1216_v2 = vpop.f32.mrb[10].mxu1  ;;  %1932 = vmatprep.mubr.msk.f32.mxu0 %vm2402_vm0, %v2403_v1  ;;  %1931 = vmatpush3.msra.mxu0 %v658_v7 }
 0x58c   : > { %v1220_v3 = vsel %vm666_vm3, %v1216_v2, -1e+30  ;;  %v1939_v4 = vpop.f32.mrb[11].mxu1  ;;  %1945 = vmatprep.subr.mxu0 %v2403_v1 }
 0x58d   : > { %v1221_v5 = vsel %vm667_vm2, %v1220_v3, -inf }
 0x58e   : > { %1222 = vmax.xlane.f32.xlu0 %v1221_v5 }
 0x592   : > { %752 = vadd.xlane.f32.xlu0 %v751_v6 }
 0x61b   : > { %v1223_v8 = vpop.xlane.xlu0 %1222 }
 0x61c   : > { %v1224_v9 = vsub.f32 %v1220_v3, %v1223_v8 }
 0x61e   : > { %v1225_v10 = vmul.f32 1.442695, %v1224_v9 }
 0x61f   : > { %v753_v11 = vpop.xlane.xlu0 %752 }
 0x620   : > { %2100 = vpow2.f32 %v1225_v10 }
 0x621   : > { %2102 = vrcp.f32 %v753_v11 }
 0x62a   : > { %v2101_v12 = vpop.eup %2100 }
 0x62b   : > { %v2103_v13 = vpop.eup %2102  ;;  %1943 = vmatmul.mubr.msk.f32.vlgmr.msra.gmra.mrb[12].mxu1 %vm667_vm2, %v2101_v12  ;;  %v1227_v14 = vsel %vm667_vm2, %v2101_v12, 0.0 }
 0x62c   : > { %v828_v15 = vmul.f32 %v2103_v13, %v824_v43  ;;  %1951 = vmatpush3.xpose.msk.msra.mxu1 %vm667_vm2, %v1385_v58  ;;  %1228 = vadd.xlane.f32.xlu0 %v1227_v14 }
 0x62d   : > { %1952 = vmatprep.mubr.msk.f32.mxu1 %vm2402_vm0, %v2403_v1 }
 0x62e   : > { %1933 = vmatmul.mubr.msk.f32.vlgmr.msra.gmra.mrb[4].mxu0 %vm667_vm2, %v828_v15 }
 0x62f   : > { %1953 = vmatmul.mubr.msk.f32.vlgmr.msra.gmra.mrb[14].mxu1 %vm667_vm2, %v1383_v59  ;;  %1947 = vmatprep.mubr.msk.f32.mxu0 %vm2402_vm0, %v2403_v1 }
 0x630   : > { %1946 = vmatpush3.msra.mxu0 %v660_v16 }
 0x631   : > { %1955 = vmatprep.subr.mxu0 %v2403_v1 }
 0x6b9   : > { %v1229_v17 = vpop.xlane.xlu0 %1228 }
 0x6ba   : > { %2104 = vrcp.f32 %v1229_v17 }
 0x6c4   : > { %v2105_v18 = vpop.eup %2104 }
 0x6fe   : > { %v1303_v19 = vpop.f32.mrb[12].mxu1 }
 0x6ff   : > { %v1307_v20 = vmul.f32 %v2105_v18, %v1303_v19  ;;  %v1944_v21 = vpop.f32.mrb[13].mxu1 }
 0x701   : > { %1948 = vmatmul.mubr.msk.f32.vlgmr.msra.gmra.mrb[4].mxu0 %vm667_vm2, %v1307_v20 }
 0x702   : > { %v1456_v22 = vpop.f32.mrb[14].mxu1  ;;  %1957 = vmatprep.mubr.msk.f32.mxu0 %vm2402_vm0, %v2403_v1 }
 0x703   : > { %v1460_v23 = vsel %vm666_vm3, %v1456_v22, -1e+30  ;;  %v1954_v24 = vpop.f32.mrb[15].mxu1 }
 0x704   : > { %v1461_v25 = vsel %vm667_vm2, %v1460_v23, -inf }
 0x705   : > { %1462 = vmax.xlane.f32.xlu0 %v1461_v25 }
 0x71b   : > { %1471 = vrot.lane.b32.xlu0 %v2783_v27, %s2406_s13  ;;  %v661_v27 = vld [vmem:[#allocation13 + $0x18] sm:$0xff] }
 0x792   : > { %v1463_v26 = vpop.xlane.xlu0 %1462 }
 0x793   : > { %v1464_v28 = vsub.f32 %v1460_v23, %v1463_v26 }
 0x795   : > { %v1465_v29 = vmul.f32 1.442695, %v1464_v28 }
 0x796   : > { %v1472_v32 = vpop.permute.xlu0 %1471 }
 0x797   : > { %2106 = vpow2.f32 %v1465_v29  ;;  %1956 = vmatpush3.msra.mxu0 %v1472_v32 }
 0x798   : > { %1960 = vmatprep.subr.mxu0 %v2403_v1 }
 0x7a1   : > { %v2107_v33 = vpop.eup %2106 }
 0x7a2   : > { %1958 = vmatmul.mubr.msk.f32.vlgmr.msra.gmra.mrb[6].mxu0 %vm667_vm2, %v2107_v33  ;;  %v1467_v30 = vsel %vm667_vm2, %v2107_v33, 0.0 }
 0x7a3   : > { %1468 = vadd.xlane.f32.xlu1 %v1467_v30  ;;  %1962 = vmatprep.mubr.msk.f32.mxu0 %vm2402_vm0, %v2403_v1 }
 0x7a4   : > { %1961 = vmatpush3.msra.mxu0 %v661_v27 }
 0x830   : > { %v1469_v31 = vpop.xlane.xlu1 %1468 }
 0x831   : > { %2108 = vrcp.f32 %v1469_v31 }
 0x83b   : > { %v2109_v34 = vpop.eup %2108 }
 0x875   : > { %v1543_v35 = vpop.f32.mrb[6].mxu0 }
 0x876   : > { %v1547_v36 = vmul.f32 %v2109_v34, %v1543_v35  ;;  %v1959_v37 = vpop.f32.mrb[7].mxu0 }
 0x878   : > { %1963 = vmatmul.mubr.msk.f32.vlgmr.msra.gmra.mrb[4].mxu0 %vm667_vm2, %v1547_v36 }
 0x94b   : > { %v1617_v1 = vpop.f32.mrb[4].mxu0 }
 0x94c   : > { %1622 = vst.msk [vmem:[%s422_s1] sm:$0xff] %vm430_vm1, %v1617_v1  ;;  %v1964_v38 = vpop.f32.mrb[5].mxu0 }
 0x94d   : > { %2325 = shalt.err (!%p2322_p4)
}
 0x94e   : > { %s2326_s3 = scalar_lea.hbm %s2864_s28, 128  ;;  %s2330_s24 = scalar_lea.hbm %s2974_s12, 256 }
 0x94f   : > { %p2327_p10 = scmp.ne.s32.totalorder %s2864_s28, %s2326_s3  ;;  %p2331_p12 = scmp.lt.u32.totalorder %s2864_s28, %s2974_s12 }
 0x950   : > { %p2332_p0 = scmp.lt.u32.totalorder %s2330_s24, %s2326_s3  ;;  %p2334_p9 = scmp.lt.u32.totalorder %s2326_s3, %s2864_s28 }
 0x951   : > { %p2328_p3 = pnand %p2327_p10, %p2975_p13 }
 0x952   : > { %p2333_p7 = por %p2332_p0, %p2331_p12 }
 0x953   : > { %p2329_p8 = pneg %p2328_p3 }
 0x954   : > { %p2335_p11 = por %p2334_p9, %p2333_p7 }
 0x956   : > { %p2336_p1 = pnand %p2335_p11, %p2329_p8 }
 0x958   : > { %2339 = shalt.err (!%p2336_p1)
}
 0x959   : > { %2011 = dma.vmem_to_hbm [thread:$0]  (%p2975_p13), %s2866_s21, 128, %s2864_s28, %s1624_s9  }
 0x95a PF: > { %s2976_s8 = sld [smem:[#allocation20_spill]]  ;;  %s2977_s19 = sld [smem:[#allocation24_spill]] }
 0x95b   : > { %s2978_s16 = sld [smem:[#allocation21_spill]] }
 0x960   : > { %s1649_s14 = sand.u32 1, %s2976_s8   ;;  %p2979_p6 = scmp.ne.s32.totalorder %s2977_s19, 0 }
 0x961   : > { %p2980_p5 = scmp.ge.s32.totalorder %s2978_s16, 2  ;;  %s1650_s11 = scalar_lea.sflag [#allocation4], %s1649_s14 }
 0x963   : > { %p2037_p2 = pnand %p2980_p5, %p2979_p6 }
 0x965   : > { %2373 = dma.done.wait (!%p2037_p2), %s1650_s11, 128  }
 0x966   : > { %2375 = vsyncadd (!%p2037_p2), %s1650_s11, 4294967168  ;;  %s2981_s27 = sld [smem:[#allocation22_spill]]  ;;  %s2982_s13 = sld [smem:[#allocation23_spill]] }
 0x967   : > { %s2983_s24 = smov %s2382_s25  ;;  %s2984_s25 = smov %s2386_s26 }
 0x96c   : > { %p25_p4 = scmp.ge.s32.totalorder %s2981_s27, 4   ;;  %s2985_s26 = smov %s2982_s13 }
 0x96e   :  { %27 = sbr.rel (!%p25_p4) target bundleno = 14 (0xe), region = 133 }
 0x975   :  { %1655 = vsyncpa [#allocation3], 1 }
 0x976   :  { %1657 = vsyncpa [#allocation3 + $0x1], 1 }
 0x977   :  { %1658 = vsyncpa [#allocation6], 1 }
 0x978   :  { %1660 = vsyncpa [#allocation6 + $0x1], 1 }
 0x979   :  { %1661 = vsyncpa [#allocation9], 1 }
 0x97a   :  { %1662 = vsyncpa [#allocation12], 1 }
 0x97b   :  { %1663 = vsyncpa [#allocation4], 1 }
 0x97c   :  { %1665 = vsyncpa [#allocation4 + $0x1], 1 }

</bundles_post_ra>
